<compile_context>
chip_gen: v5e
topology: v5e:2x2
jax: 0.10.0
libtpu: 0.0.40
codegen_flags: <defaults>
</compile_context>

<pallas_src>
import math
import functools

import jax
import jax.numpy as jnp
from jax.experimental import pallas as pl
from jax.experimental.pallas import tpu as pltpu


def _pick_group_size(num_heads, head_size, target_lanes=256):
    """Largest divisor of num_heads with group_size*head_size <= target_lanes."""
    target = max(1, target_lanes // max(1, head_size))
    g = 1
    for cand in range(1, num_heads + 1):
        if num_heads % cand == 0 and cand <= target:
            g = cand
    return g


def _default_vmem_limit_bytes():
    """Per-generation scoped-VMEM limit with headroom (don't hardcode 64 MiB)."""
    try:
        info = pltpu.get_tpu_info()
        cap = getattr(info, "vmem_capacity_bytes", None)
        if cap:
            return min(int(cap) * 3 // 4, 112 * 1024 * 1024)
    except Exception:
        pass
    return 48 * 1024 * 1024


def bert_attention_kernel(*refs, group_size, head_size, num_groups, ln_eps, has_mask):
    if has_mask:
        (x_ref, mask_ref, wqkv_ref, bqkv_ref, wo_ref,
         bo_ref, gamma_ref, beta_ref, out_ref, acc_ref) = refs
    else:
        (x_ref, wqkv_ref, bqkv_ref, wo_ref,
         bo_ref, gamma_ref, beta_ref, out_ref, acc_ref) = refs
        mask_ref = None

    g = pl.program_id(1)
    ghd = group_size * head_size

    @pl.when(g == 0)
    def _init():
        acc_ref[...] = jnp.zeros_like(acc_ref)

    x = x_ref[0]                                                   # (S, D) bf16

    # Fused group QKV projection: one MXU matmul over the full hidden D, N = 3*G*hd.
    # Weights are resident in VMEM; pick this group's slab with a dynamic index.
    qkv = jnp.dot(x, wqkv_ref[g], preferred_element_type=jnp.float32) + bqkv_ref[g]
    # qkv: (S, 3*G*hd) f32, columns laid out as [q_h0..q_hG-1 | k_h0.. | v_h0..].

    if has_mask:
        # Additive bias computed in-kernel (VPU): (2 - mask) * 1e6, f32.
        bias = (2.0 - mask_ref[0].astype(jnp.float32)) * 1000000.0  # (S, S)
    else:
        bias = None

    scale = 1.0 / math.sqrt(head_size)
    ctx_parts = []
    # Static unrolled loop over the heads of this group (G is small: 1-4).
    for i in range(group_size):
        q0 = i * head_size
        qh = (qkv[:, q0:q0 + head_size] * scale).astype(jnp.bfloat16)            # scale folded in
        kh = qkv[:, ghd + q0:ghd + q0 + head_size].astype(jnp.bfloat16)
        vh = qkv[:, 2 * ghd + q0:2 * ghd + q0 + head_size].astype(jnp.bfloat16)

        # scores = (q / sqrt(hd)) @ k^T without an explicit transpose (contract last dims).
        scores = jax.lax.dot_general(
            qh, kh,
            dimension_numbers=(((1,), (1,)), ((), ())),
            preferred_element_type=jnp.float32)                                   # (S, S) f32
        if bias is not None:
            scores = scores - bias

        m = jnp.max(scores, axis=-1, keepdims=True)
        e = jnp.exp(scores - m)
        probs = e * pl.reciprocal(jnp.sum(e, axis=-1, keepdims=True), approx=True)

        ctx_parts.append(jnp.dot(probs.astype(jnp.bfloat16), vh,
                                 preferred_element_type=jnp.float32))             # (S, hd) f32

    # One wide output-projection matmul per group: K = G*hd (instead of K = hd per head).
    ctx = ctx_parts[0] if group_size == 1 else jnp.concatenate(ctx_parts, axis=-1)
    acc_ref[...] += jnp.dot(ctx.astype(jnp.bfloat16), wo_ref[g],
                            preferred_element_type=jnp.float32)

    @pl.when(g == num_groups - 1)
    def _finalize():
        hres = acc_ref[...] + bo_ref[...] + x.astype(jnp.float32)   # + bias + residual
        mean = jnp.mean(hres, axis=-1, keepdims=True)
        c = hres - mean
        var = jnp.mean(c * c, axis=-1, keepdims=True)
        normed = c * jax.lax.rsqrt(var + ln_eps)
        out_ref[0] = (normed * gamma_ref[...] + beta_ref[...]).astype(out_ref.dtype)


def bert_attention(x, attention_mask, params, *, num_heads, ln_eps=1e-12, group_size=None):
    B, S, D = x.shape
    hd = D // num_heads
    if group_size is None:
        group_size = _pick_group_size(num_heads, hd)
    assert num_heads % group_size == 0
    num_groups = num_heads // group_size
    ghd = group_size * hd
    f32, bf16 = jnp.float32, jnp.bfloat16

    # ---- wrapper-side layout prep (one-time XLA ops) ----
    # Fused per-group QKV weight: (num_groups, D, 3*ghd), columns [q_grp | k_grp | v_grp],
    # head-major inside each region (matches the per-head ctx concatenation order).
    wq = params["wq"].reshape(D, num_groups, ghd)
    wk = params["wk"].reshape(D, num_groups, ghd)
    wv = params["wv"].reshape(D, num_groups, ghd)
    w_qkv = jnp.transpose(jnp.concatenate([wq, wk, wv], axis=-1), (1, 0, 2)).astype(bf16)

    bq = params["bq"].reshape(num_groups, ghd)
    bk = params["bk"].reshape(num_groups, ghd)
    bv = params["bv"].reshape(num_groups, ghd)
    b_qkv = jnp.concatenate([bq, bk, bv], axis=-1).reshape(num_groups, 1, 3 * ghd).astype(f32)

    # Output-projection weight grouped by head-group rows: (num_groups, ghd, D).
    w_o = params["wo"].reshape(num_groups, ghd, D).astype(bf16)
    b_o = params["bo"].astype(f32)          # (1, D)
    gamma = params["gamma"].astype(f32)     # (1, D)
    beta = params["beta"].astype(f32)       # (1, D)

    x_bf16 = x.astype(bf16)
    has_mask = attention_mask is not None

    kernel = functools.partial(
        bert_attention_kernel,
        group_size=group_size, head_size=hd, num_groups=num_groups,
        ln_eps=ln_eps, has_mask=has_mask,
    )

    in_specs = [pl.BlockSpec((1, S, D), lambda b, g: (b, 0, 0))]            # x (bf16)
    args = [x_bf16]
    if has_mask:
        in_specs.append(pl.BlockSpec((1, S, S), lambda b, g: (b, 0, 0)))    # raw mask (bf16)
        args.append(attention_mask.astype(bf16))
    # Resident weights: full-array blocks + constant index_map => fetched once, stay in VMEM.
    in_specs += [
        pl.BlockSpec((num_groups, D, 3 * ghd), lambda b, g: (0, 0, 0)),     # fused W_qkv
        pl.BlockSpec((num_groups, 1, 3 * ghd), lambda b, g: (0, 0, 0)),     # fused b_qkv
        pl.BlockSpec((num_groups, ghd, D), lambda b, g: (0, 0, 0)),         # W_o (grouped rows)
        pl.BlockSpec((1, D), lambda b, g: (0, 0)),                          # b_o
        pl.BlockSpec((1, D), lambda b, g: (0, 0)),                          # gamma
        pl.BlockSpec((1, D), lambda b, g: (0, 0)),                          # beta
    ]
    args += [w_qkv, b_qkv, w_o, b_o, gamma, beta]

    return pl.pallas_call(
        kernel,
        out_shape=jax.ShapeDtypeStruct((B, S, D), x.dtype),
        grid_spec=pltpu.PrefetchScalarGridSpec(
            num_scalar_prefetch=0,
            grid=(B, num_groups),
            in_specs=in_specs,
            out_specs=pl.BlockSpec((1, S, D), lambda b, g: (b, 0, 0)),
            scratch_shapes=[pltpu.VMEM((S, D), jnp.float32)],               # output-proj accumulator
        ),
        compiler_params=pltpu.CompilerParams(
            dimension_semantics=("parallel", "arbitrary"),
            vmem_limit_bytes=_default_vmem_limit_bytes(),
        ),
    )(*args)


def reference_bert_attention(x, mask, params, *, num_heads, ln_eps=1e-12):
    """Pure-JAX reference mirroring the PyTorch module (eval mode).

    Matmul operands (x, W*) are rounded through bf16 to match the kernel's MXU dtype; the
    math itself is done in f32.
    """
    B, S, D = x.shape
    hd = D // num_heads
    rt = lambda a: a.astype(jnp.bfloat16).astype(jnp.float32)

    xq = rt(x)
    wq, wk, wv, wo = rt(params["wq"]), rt(params["wk"]), rt(params["wv"]), rt(params["wo"])

    def lin(a, w, b):
        return a @ w + b[0]

    q = lin(xq, wq, params["bq"]).reshape(B, S, num_heads, hd).transpose(0, 2, 1, 3)
    k = lin(xq, wk, params["bk"]).reshape(B, S, num_heads, hd).transpose(0, 2, 1, 3)
    v = lin(xq, wv, params["bv"]).reshape(B, S, num_heads, hd).transpose(0, 2, 1, 3)

    scores = jnp.einsum("bhqd,bhkd->bhqk", q, k) / math.sqrt(hd)
    if mask is not None:
        scores = scores - (2.0 - mask[:, None, :, :]) * 1000000.0
    probs = jax.nn.softmax(scores, axis=-1)
    ctx = jnp.einsum("bhqk,bhkd->bhqd", probs, v).transpose(0, 2, 1, 3).reshape(B, S, D)

    proj = lin(ctx, wo, params["bo"]) + xq
    mean = proj.mean(-1, keepdims=True)
    var = ((proj - mean) ** 2).mean(-1, keepdims=True)
    return (proj - mean) / jnp.sqrt(var + ln_eps) * params["gamma"][0] + params["beta"][0]


if __name__ == "__main__":
    # Small config consistent with the module: hidden=32, heads=4, seq=8, batch=2.
    B, S, D, H = 2, 8, 32, 4

    key = jax.random.PRNGKey(0)
    keys = jax.random.split(key, 12)
    init = lambda k, shape, scale=0.05: (scale * jax.random.normal(k, shape)).astype(jnp.float32)

    params = {
        "wq": init(keys[0], (D, D)), "bq": init(keys[1], (1, D)),
        "wk": init(keys[2], (D, D)), "bk": init(keys[3], (1, D)),
        "wv": init(keys[4], (D, D)), "bv": init(keys[5], (1, D)),
        "wo": init(keys[6], (D, D)), "bo": init(keys[7], (1, D)),
        "gamma": jnp.ones((1, D), jnp.float32),
        "beta": jnp.zeros((1, D), jnp.float32),
    }

    x = init(keys[8], (B, S, D), scale=1.0)
    # Mask following the module's convention: value 2 => keep, value 0 => -2e6 bias (masked).
    causal = jnp.tril(jnp.ones((S, S), jnp.float32))
    mask = jnp.broadcast_to(jnp.where(causal > 0, 2.0, 0.0), (B, S, S)).astype(jnp.float32)

    out = bert_attention(x, mask, params, num_heads=H)
    out = jax.block_until_ready(out)

    ref = reference_bert_attention(x, mask, params, num_heads=H)
    assert out.shape == (B, S, D)
    err = float(jnp.max(jnp.abs(out - ref)))
    assert jnp.allclose(out, ref, atol=2e-2, rtol=2e-2), err

    # Also exercise the mask=None path (operand dropped entirely).
    out_nm = jax.block_until_ready(bert_attention(x, None, params, num_heads=H))
    ref_nm = reference_bert_attention(x, None, params, num_heads=H)
    assert jnp.allclose(out_nm, ref_nm, atol=2e-2, rtol=2e-2)

    print("KERNEL_OK")
</pallas_src>

<mosaic_0001>
module attributes {stable_mosaic.version = 11 : i64} {
  func.func @bert_attention_kernel(%arg0: i32, %arg1: i32, %arg2: memref<1x8x32xbf16, #tpu.memory_space<vmem>>, %arg3: memref<1x8x8xbf16, #tpu.memory_space<vmem>>, %arg4: memref<1x32x96xbf16, #tpu.memory_space<vmem>>, %arg5: memref<1x1x96xf32, #tpu.memory_space<vmem>>, %arg6: memref<1x32x32xbf16, #tpu.memory_space<vmem>>, %arg7: memref<1x32xf32, #tpu.memory_space<vmem>>, %arg8: memref<1x32xf32, #tpu.memory_space<vmem>>, %arg9: memref<1x32xf32, #tpu.memory_space<vmem>>, %arg10: memref<1x8x32xf32, #tpu.memory_space<vmem>>, %arg11: memref<8x32xf32, #tpu.memory_space<vmem>>) attributes {dimension_semantics = [#tpu.dimension_semantics<parallel>, #tpu.dimension_semantics<arbitrary>], iteration_bounds = array<i64: 2, 1>, scalar_prefetch = 0 : i64, scratch_operands = 1 : i64, tpu.core_type = #tpu.core_type<tc>, window_params = [{transform_indices = @transform_0, window_bounds = array<i64: 1, 8, 32>}, {transform_indices = @transform_1, window_bounds = array<i64: 1, 8, 8>}, {pipeline_mode = #tpu.pipeline_mode<synchronous>, transform_indices = @transform_2, window_bounds = array<i64: 1, 32, 96>}, {pipeline_mode = #tpu.pipeline_mode<synchronous>, transform_indices = @transform_3, window_bounds = array<i64: 1, 1, 96>}, {pipeline_mode = #tpu.pipeline_mode<synchronous>, transform_indices = @transform_4, window_bounds = array<i64: 1, 32, 32>}, {pipeline_mode = #tpu.pipeline_mode<synchronous>, transform_indices = @transform_5, window_bounds = array<i64: 1, 32>}, {pipeline_mode = #tpu.pipeline_mode<synchronous>, transform_indices = @transform_6, window_bounds = array<i64: 1, 32>}, {pipeline_mode = #tpu.pipeline_mode<synchronous>, transform_indices = @transform_7, window_bounds = array<i64: 1, 32>}, {transform_indices = @transform_8, window_bounds = array<i64: 1, 8, 32>}]} {
    %c0_i32 = arith.constant 0 : i32
    %0 = arith.cmpi eq, %arg1, %c0_i32 : i32
    %1 = arith.extui %0 : i1 to i32
    %c0_i32_0 = arith.constant 0 : i32
    %2 = arith.cmpi ne, %1, %c0_i32_0 : i32
    scf.if %2 {
      %cst_41 = arith.constant 0.000000e+00 : f32
      %121 = vector.broadcast %cst_41 : f32 to vector<8x32xf32>
      %c0_42 = arith.constant 0 : index
      %c0_43 = arith.constant 0 : index
      %122 = vector.load %arg11[%c0_42, %c0_43] : memref<8x32xf32, #tpu.memory_space<vmem>>, vector<8x32xf32>
      tpu.vector_store %arg11[%c0_42, %c0_43], %121 {strides = array<i32>} : memref<8x32xf32, #tpu.memory_space<vmem>>, vector<8x32xf32>,
    } else {
    }
    %c0 = arith.constant 0 : index
    %c0_1 = arith.constant 0 : index
    %c0_2 = arith.constant 0 : index
    %3 = vector.load %arg2[%c0, %c0_1, %c0_2] : memref<1x8x32xbf16, #tpu.memory_space<vmem>>, vector<1x8x32xbf16>
    %4 = vector.shape_cast %3 : vector<1x8x32xbf16> to vector<8x32xbf16>
    %5 = arith.index_cast %arg1 : i32 to index
    %c0_3 = arith.constant 0 : index
    %c0_4 = arith.constant 0 : index
    %6 = vector.load %arg4[%5, %c0_3, %c0_4] : memref<1x32x96xbf16, #tpu.memory_space<vmem>>, vector<1x32x96xbf16>
    %7 = vector.shape_cast %6 : vector<1x32x96xbf16> to vector<32x96xbf16>
    %cst = arith.constant dense<0.000000e+00> : vector<8x96xf32>
    %8 = tpu.matmul %4, %7, %cst {dimension_numbers = #tpu.dot_dimension_numbers<[1], [0], [0], [1], [0, 0, 1, 1], [], []>} : vector<8x32xbf16>, vector<32x96xbf16>, vector<8x96xf32> -> vector<8x96xf32>
    %9 = arith.index_cast %arg1 : i32 to index
    %c0_5 = arith.constant 0 : index
    %c0_6 = arith.constant 0 : index
    %10 = vector.load %arg5[%9, %c0_5, %c0_6] : memref<1x1x96xf32, #tpu.memory_space<vmem>>, vector<1x1x96xf32>
    %11 = vector.shape_cast %10 : vector<1x1x96xf32> to vector<1x96xf32>
    %12 = vector.broadcast %11 : vector<1x96xf32> to vector<8x96xf32>
    %13 = arith.addf %8, %12 : vector<8x96xf32>
    %c0_7 = arith.constant 0 : index
    %c0_8 = arith.constant 0 : index
    %c0_9 = arith.constant 0 : index
    %14 = vector.load %arg3[%c0_7, %c0_8, %c0_9] : memref<1x8x8xbf16, #tpu.memory_space<vmem>>, vector<1x8x8xbf16>
    %15 = vector.shape_cast %14 : vector<1x8x8xbf16> to vector<8x8xbf16>
    %16 = arith.extf %15 : vector<8x8xbf16> to vector<8x8xf32>
    %cst_10 = arith.constant 2.000000e+00 : f32
    %17 = vector.broadcast %cst_10 : f32 to vector<8x8xf32>
    %18 = arith.subf %17, %16 : vector<8x8xf32>
    %cst_11 = arith.constant 1.000000e+06 : f32
    %19 = vector.broadcast %cst_11 : f32 to vector<8x8xf32>
    %20 = arith.mulf %18, %19 : vector<8x8xf32>
    %21 = vector.extract_strided_slice %13 {offsets = [0, 0], sizes = [8, 8], strides = [1, 1]} : vector<8x96xf32> to vector<8x8xf32>
    %cst_12 = arith.constant 0.353553385 : f32
    %22 = vector.broadcast %cst_12 : f32 to vector<8x8xf32>
    %23 = arith.mulf %21, %22 : vector<8x8xf32>
    %24 = arith.truncf %23 : vector<8x8xf32> to vector<8x8xbf16>
    %25 = vector.extract_strided_slice %13 {offsets = [0, 32], sizes = [8, 8], strides = [1, 1]} : vector<8x96xf32> to vector<8x8xf32>
    %26 = arith.truncf %25 : vector<8x8xf32> to vector<8x8xbf16>
    %27 = vector.extract_strided_slice %13 {offsets = [0, 64], sizes = [8, 8], strides = [1, 1]} : vector<8x96xf32> to vector<8x8xf32>
    %28 = arith.truncf %27 : vector<8x8xf32> to vector<8x8xbf16>
    %cst_13 = arith.constant dense<0.000000e+00> : vector<8x8xf32>
    %29 = tpu.matmul %24, %26, %cst_13 {dimension_numbers = #tpu.dot_dimension_numbers<[1], [1], [0], [0], [0, 0, 1, 0], [], []>} : vector<8x8xbf16>, vector<8x8xbf16>, vector<8x8xf32> -> vector<8x8xf32>
    %30 = arith.subf %29, %20 : vector<8x8xf32>
    %cst_14 = arith.constant dense<0xFF800000> : vector<8xf32>
    %31 = vector.multi_reduction <maximumf>, %30, %cst_14 [1] : vector<8x8xf32> to vector<8xf32>
    %32 = vector.shape_cast %31 : vector<8xf32> to vector<8x1xf32>
    %33 = vector.broadcast %32 : vector<8x1xf32> to vector<8x8xf32>
    %34 = arith.subf %30, %33 : vector<8x8xf32>
    %35 = math.exp %34 : vector<8x8xf32>
    %cst_15 = arith.constant dense<0.000000e+00> : vector<8xf32>
    %36 = vector.multi_reduction <add>, %35, %cst_15 [1] : vector<8x8xf32> to vector<8xf32>
    %37 = vector.shape_cast %36 : vector<8xf32> to vector<8x1xf32>
    %38 = tpu.reciprocal %37 {approx = true} : vector<8x1xf32> -> vector<8x1xf32>
    %39 = vector.broadcast %38 : vector<8x1xf32> to vector<8x8xf32>
    %40 = arith.mulf %35, %39 : vector<8x8xf32>
    %41 = arith.truncf %40 : vector<8x8xf32> to vector<8x8xbf16>
    %cst_16 = arith.constant dense<0.000000e+00> : vector<8x8xf32>
    %42 = tpu.matmul %41, %28, %cst_16 {dimension_numbers = #tpu.dot_dimension_numbers<[1], [0], [0], [1], [0, 0, 1, 1], [], []>} : vector<8x8xbf16>, vector<8x8xbf16>, vector<8x8xf32> -> vector<8x8xf32>
    %43 = vector.extract_strided_slice %13 {offsets = [0, 8], sizes = [8, 8], strides = [1, 1]} : vector<8x96xf32> to vector<8x8xf32>
    %cst_17 = arith.constant 0.353553385 : f32
    %44 = vector.broadcast %cst_17 : f32 to vector<8x8xf32>
    %45 = arith.mulf %43, %44 : vector<8x8xf32>
    %46 = arith.truncf %45 : vector<8x8xf32> to vector<8x8xbf16>
    %47 = vector.extract_strided_slice %13 {offsets = [0, 40], sizes = [8, 8], strides = [1, 1]} : vector<8x96xf32> to vector<8x8xf32>
    %48 = arith.truncf %47 : vector<8x8xf32> to vector<8x8xbf16>
    %49 = vector.extract_strided_slice %13 {offsets = [0, 72], sizes = [8, 8], strides = [1, 1]} : vector<8x96xf32> to vector<8x8xf32>
    %50 = arith.truncf %49 : vector<8x8xf32> to vector<8x8xbf16>
    %cst_18 = arith.constant dense<0.000000e+00> : vector<8x8xf32>
    %51 = tpu.matmul %46, %48, %cst_18 {dimension_numbers = #tpu.dot_dimension_numbers<[1], [1], [0], [0], [0, 0, 1, 0], [], []>} : vector<8x8xbf16>, vector<8x8xbf16>, vector<8x8xf32> -> vector<8x8xf32>
    %52 = arith.subf %51, %20 : vector<8x8xf32>
    %cst_19 = arith.constant dense<0xFF800000> : vector<8xf32>
    %53 = vector.multi_reduction <maximumf>, %52, %cst_19 [1] : vector<8x8xf32> to vector<8xf32>
    %54 = vector.shape_cast %53 : vector<8xf32> to vector<8x1xf32>
    %55 = vector.broadcast %54 : vector<8x1xf32> to vector<8x8xf32>
    %56 = arith.subf %52, %55 : vector<8x8xf32>
    %57 = math.exp %56 : vector<8x8xf32>
    %cst_20 = arith.constant dense<0.000000e+00> : vector<8xf32>
    %58 = vector.multi_reduction <add>, %57, %cst_20 [1] : vector<8x8xf32> to vector<8xf32>
    %59 = vector.shape_cast %58 : vector<8xf32> to vector<8x1xf32>
    %60 = tpu.reciprocal %59 {approx = true} : vector<8x1xf32> -> vector<8x1xf32>
    %61 = vector.broadcast %60 : vector<8x1xf32> to vector<8x8xf32>
    %62 = arith.mulf %57, %61 : vector<8x8xf32>
    %63 = arith.truncf %62 : vector<8x8xf32> to vector<8x8xbf16>
    %cst_21 = arith.constant dense<0.000000e+00> : vector<8x8xf32>
    %64 = tpu.matmul %63, %50, %cst_21 {dimension_numbers = #tpu.dot_dimension_numbers<[1], [0], [0], [1], [0, 0, 1, 1], [], []>} : vector<8x8xbf16>, vector<8x8xbf16>, vector<8x8xf32> -> vector<8x8xf32>
    %65 = vector.extract_strided_slice %13 {offsets = [0, 16], sizes = [8, 8], strides = [1, 1]} : vector<8x96xf32> to vector<8x8xf32>
    %cst_22 = arith.constant 0.353553385 : f32
    %66 = vector.broadcast %cst_22 : f32 to vector<8x8xf32>
    %67 = arith.mulf %65, %66 : vector<8x8xf32>
    %68 = arith.truncf %67 : vector<8x8xf32> to vector<8x8xbf16>
    %69 = vector.extract_strided_slice %13 {offsets = [0, 48], sizes = [8, 8], strides = [1, 1]} : vector<8x96xf32> to vector<8x8xf32>
    %70 = arith.truncf %69 : vector<8x8xf32> to vector<8x8xbf16>
    %71 = vector.extract_strided_slice %13 {offsets = [0, 80], sizes = [8, 8], strides = [1, 1]} : vector<8x96xf32> to vector<8x8xf32>
    %72 = arith.truncf %71 : vector<8x8xf32> to vector<8x8xbf16>
    %cst_23 = arith.constant dense<0.000000e+00> : vector<8x8xf32>
    %73 = tpu.matmul %68, %70, %cst_23 {dimension_numbers = #tpu.dot_dimension_numbers<[1], [1], [0], [0], [0, 0, 1, 0], [], []>} : vector<8x8xbf16>, vector<8x8xbf16>, vector<8x8xf32> -> vector<8x8xf32>
    %74 = arith.subf %73, %20 : vector<8x8xf32>
    %cst_24 = arith.constant dense<0xFF800000> : vector<8xf32>
    %75 = vector.multi_reduction <maximumf>, %74, %cst_24 [1] : vector<8x8xf32> to vector<8xf32>
    %76 = vector.shape_cast %75 : vector<8xf32> to vector<8x1xf32>
    %77 = vector.broadcast %76 : vector<8x1xf32> to vector<8x8xf32>
    %78 = arith.subf %74, %77 : vector<8x8xf32>
    %79 = math.exp %78 : vector<8x8xf32>
    %cst_25 = arith.constant dense<0.000000e+00> : vector<8xf32>
    %80 = vector.multi_reduction <add>, %79, %cst_25 [1] : vector<8x8xf32> to vector<8xf32>
    %81 = vector.shape_cast %80 : vector<8xf32> to vector<8x1xf32>
    %82 = tpu.reciprocal %81 {approx = true} : vector<8x1xf32> -> vector<8x1xf32>
    %83 = vector.broadcast %82 : vector<8x1xf32> to vector<8x8xf32>
    %84 = arith.mulf %79, %83 : vector<8x8xf32>
    %85 = arith.truncf %84 : vector<8x8xf32> to vector<8x8xbf16>
    %cst_26 = arith.constant dense<0.000000e+00> : vector<8x8xf32>
    %86 = tpu.matmul %85, %72, %cst_26 {dimension_numbers = #tpu.dot_dimension_numbers<[1], [0], [0], [1], [0, 0, 1, 1], [], []>} : vector<8x8xbf16>, vector<8x8xbf16>, vector<8x8xf32> -> vector<8x8xf32>
    %87 = vector.extract_strided_slice %13 {offsets = [0, 24], sizes = [8, 8], strides = [1, 1]} : vector<8x96xf32> to vector<8x8xf32>
    %cst_27 = arith.constant 0.353553385 : f32
    %88 = vector.broadcast %cst_27 : f32 to vector<8x8xf32>
    %89 = arith.mulf %87, %88 : vector<8x8xf32>
    %90 = arith.truncf %89 : vector<8x8xf32> to vector<8x8xbf16>
    %91 = vector.extract_strided_slice %13 {offsets = [0, 56], sizes = [8, 8], strides = [1, 1]} : vector<8x96xf32> to vector<8x8xf32>
    %92 = arith.truncf %91 : vector<8x8xf32> to vector<8x8xbf16>
    %93 = vector.extract_strided_slice %13 {offsets = [0, 88], sizes = [8, 8], strides = [1, 1]} : vector<8x96xf32> to vector<8x8xf32>
    %94 = arith.truncf %93 : vector<8x8xf32> to vector<8x8xbf16>
    %cst_28 = arith.constant dense<0.000000e+00> : vector<8x8xf32>
    %95 = tpu.matmul %90, %92, %cst_28 {dimension_numbers = #tpu.dot_dimension_numbers<[1], [1], [0], [0], [0, 0, 1, 0], [], []>} : vector<8x8xbf16>, vector<8x8xbf16>, vector<8x8xf32> -> vector<8x8xf32>
    %96 = arith.subf %95, %20 : vector<8x8xf32>
    %cst_29 = arith.constant dense<0xFF800000> : vector<8xf32>
    %97 = vector.multi_reduction <maximumf>, %96, %cst_29 [1] : vector<8x8xf32> to vector<8xf32>
    %98 = vector.shape_cast %97 : vector<8xf32> to vector<8x1xf32>
    %99 = vector.broadcast %98 : vector<8x1xf32> to vector<8x8xf32>
    %100 = arith.subf %96, %99 : vector<8x8xf32>
    %101 = math.exp %100 : vector<8x8xf32>
    %cst_30 = arith.constant dense<0.000000e+00> : vector<8xf32>
    %102 = vector.multi_reduction <add>, %101, %cst_30 [1] : vector<8x8xf32> to vector<8xf32>
    %103 = vector.shape_cast %102 : vector<8xf32> to vector<8x1xf32>
    %104 = tpu.reciprocal %103 {approx = true} : vector<8x1xf32> -> vector<8x1xf32>
    %105 = vector.broadcast %104 : vector<8x1xf32> to vector<8x8xf32>
    %106 = arith.mulf %101, %105 : vector<8x8xf32>
    %107 = arith.truncf %106 : vector<8x8xf32> to vector<8x8xbf16>
    %cst_31 = arith.constant dense<0.000000e+00> : vector<8x8xf32>
    %108 = tpu.matmul %107, %94, %cst_31 {dimension_numbers = #tpu.dot_dimension_numbers<[1], [0], [0], [1], [0, 0, 1, 1], [], []>} : vector<8x8xbf16>, vector<8x8xbf16>, vector<8x8xf32> -> vector<8x8xf32>
    %109 = tpu.concatenate %42, %64, %86, %108 in 1 : vector<8x8xf32>, vector<8x8xf32>, vector<8x8xf32>, vector<8x8xf32> -> vector<8x32xf32>
    %c0_32 = arith.constant 0 : index
    %c0_33 = arith.constant 0 : index
    %110 = vector.load %arg11[%c0_32, %c0_33] : memref<8x32xf32, #tpu.memory_space<vmem>>, vector<8x32xf32>
    %111 = arith.truncf %109 : vector<8x32xf32> to vector<8x32xbf16>
    %112 = arith.index_cast %arg1 : i32 to index
    %c0_34 = arith.constant 0 : index
    %c0_35 = arith.constant 0 : index
    %113 = vector.load %arg6[%112, %c0_34, %c0_35] : memref<1x32x32xbf16, #tpu.memory_space<vmem>>, vector<1x32x32xbf16>
    %114 = vector.shape_cast %113 : vector<1x32x32xbf16> to vector<32x32xbf16>
    %cst_36 = arith.constant dense<0.000000e+00> : vector<8x32xf32>
    %115 = tpu.matmul %111, %114, %cst_36 {dimension_numbers = #tpu.dot_dimension_numbers<[1], [0], [0], [1], [0, 0, 1, 1], [], []>} : vector<8x32xbf16>, vector<32x32xbf16>, vector<8x32xf32> -> vector<8x32xf32>
    %116 = arith.addf %110, %115 : vector<8x32xf32>
    %c0_37 = arith.constant 0 : index
    %c0_38 = arith.constant 0 : index
    %117 = vector.load %arg11[%c0_37, %c0_38] : memref<8x32xf32, #tpu.memory_space<vmem>>, vector<8x32xf32>
    tpu.vector_store %arg11[%c0_37, %c0_38], %116 {strides = array<i32>} : memref<8x32xf32, #tpu.memory_space<vmem>>, vector<8x32xf32>,
    %c0_i32_39 = arith.constant 0 : i32
    %118 = arith.cmpi eq, %arg1, %c0_i32_39 : i32
    %119 = arith.extui %118 : i1 to i32
    %c0_i32_40 = arith.constant 0 : i32
    %120 = arith.cmpi ne, %119, %c0_i32_40 : i32
    scf.if %120 {
      %c0_41 = arith.constant 0 : index
      %c0_42 = arith.constant 0 : index
      %121 = vector.load %arg11[%c0_41, %c0_42] : memref<8x32xf32, #tpu.memory_space<vmem>>, vector<8x32xf32>
      %c0_43 = arith.constant 0 : index
      %c0_44 = arith.constant 0 : index
      %122 = vector.load %arg7[%c0_43, %c0_44] : memref<1x32xf32, #tpu.memory_space<vmem>>, vector<1x32xf32>
      %123 = vector.broadcast %122 : vector<1x32xf32> to vector<8x32xf32>
      %124 = arith.addf %121, %123 : vector<8x32xf32>
      %125 = arith.extf %4 : vector<8x32xbf16> to vector<8x32xf32>
      %126 = arith.addf %124, %125 : vector<8x32xf32>
      %cst_45 = arith.constant dense<0.000000e+00> : vector<8xf32>
      %127 = vector.multi_reduction <add>, %126, %cst_45 [1] : vector<8x32xf32> to vector<8xf32>
      %128 = vector.shape_cast %127 : vector<8xf32> to vector<8x1xf32>
      %cst_46 = arith.constant 3.200000e+01 : f32
      %129 = vector.broadcast %cst_46 : f32 to vector<8x1xf32>
      %130 = arith.divf %128, %129 : vector<8x1xf32>
      %131 = vector.broadcast %130 : vector<8x1xf32> to vector<8x32xf32>
      %132 = arith.subf %126, %131 : vector<8x32xf32>
      %133 = arith.mulf %132, %132 : vector<8x32xf32>
      %cst_47 = arith.constant dense<0.000000e+00> : vector<8xf32>
      %134 = vector.multi_reduction <add>, %133, %cst_47 [1] : vector<8x32xf32> to vector<8xf32>
      %135 = vector.shape_cast %134 : vector<8xf32> to vector<8x1xf32>
      %cst_48 = arith.constant 3.200000e+01 : f32
      %136 = vector.broadcast %cst_48 : f32 to vector<8x1xf32>
      %137 = arith.divf %135, %136 : vector<8x1xf32>
      %cst_49 = arith.constant 9.99999996E-13 : f32
      %138 = vector.broadcast %cst_49 : f32 to vector<8x1xf32>
      %139 = arith.addf %137, %138 : vector<8x1xf32>
      %140 = math.rsqrt %139 : vector<8x1xf32>
      %141 = vector.broadcast %140 : vector<8x1xf32> to vector<8x32xf32>
      %142 = arith.mulf %132, %141 : vector<8x32xf32>
      %c0_50 = arith.constant 0 : index
      %c0_51 = arith.constant 0 : index
      %143 = vector.load %arg8[%c0_50, %c0_51] : memref<1x32xf32, #tpu.memory_space<vmem>>, vector<1x32xf32>
      %144 = vector.broadcast %143 : vector<1x32xf32> to vector<8x32xf32>
      %145 = arith.mulf %142, %144 : vector<8x32xf32>
      %c0_52 = arith.constant 0 : index
      %c0_53 = arith.constant 0 : index
      %146 = vector.load %arg9[%c0_52, %c0_53] : memref<1x32xf32, #tpu.memory_space<vmem>>, vector<1x32xf32>
      %147 = vector.broadcast %146 : vector<1x32xf32> to vector<8x32xf32>
      %148 = arith.addf %145, %147 : vector<8x32xf32>
      %c0_54 = arith.constant 0 : index
      %c0_55 = arith.constant 0 : index
      %c0_56 = arith.constant 0 : index
      %149 = vector.load %arg10[%c0_54, %c0_55, %c0_56] : memref<1x8x32xf32, #tpu.memory_space<vmem>>, vector<1x8x32xf32>
      %150 = vector.shape_cast %149 : vector<1x8x32xf32> to vector<8x32xf32>
      %151 = vector.shape_cast %148 : vector<8x32xf32> to vector<1x8x32xf32>
      tpu.vector_store %arg10[%c0_54, %c0_55, %c0_56], %151 {strides = array<i32>} : memref<1x8x32xf32, #tpu.memory_space<vmem>>, vector<1x8x32xf32>,
    } else {
    }
    return
  }
  func.func @transform_0(%arg0: i32, %arg1: i32) -> (i32, i32, i32) {
    %c0_i32 = arith.constant 0 : i32
    %c0_i32_0 = arith.constant 0 : i32
    %c0_i32_1 = arith.constant 0 : i32
    return %arg0, %c0_i32, %c0_i32_0 : i32, i32, i32
  }
  func.func @transform_1(%arg0: i32, %arg1: i32) -> (i32, i32, i32) {
    %c0_i32 = arith.constant 0 : i32
    %c0_i32_0 = arith.constant 0 : i32
    %c0_i32_1 = arith.constant 0 : i32
    return %arg0, %c0_i32, %c0_i32_0 : i32, i32, i32
  }
  func.func @transform_2(%arg0: i32, %arg1: i32) -> (i32, i32, i32) {
    %c0_i32 = arith.constant 0 : i32
    %c0_i32_0 = arith.constant 0 : i32
    %c0_i32_1 = arith.constant 0 : i32
    %c0_i32_2 = arith.constant 0 : i32
    return %c0_i32, %c0_i32_0, %c0_i32_1 : i32, i32, i32
  }
  func.func @transform_3(%arg0: i32, %arg1: i32) -> (i32, i32, i32) {
    %c0_i32 = arith.constant 0 : i32
    %c0_i32_0 = arith.constant 0 : i32
    %c0_i32_1 = arith.constant 0 : i32
    %c0_i32_2 = arith.constant 0 : i32
    return %c0_i32, %c0_i32_0, %c0_i32_1 : i32, i32, i32
  }
  func.func @transform_4(%arg0: i32, %arg1: i32) -> (i32, i32, i32) {
    %c0_i32 = arith.constant 0 : i32
    %c0_i32_0 = arith.constant 0 : i32
    %c0_i32_1 = arith.constant 0 : i32
    %c0_i32_2 = arith.constant 0 : i32
    return %c0_i32, %c0_i32_0, %c0_i32_1 : i32, i32, i32
  }
  func.func @transform_5(%arg0: i32, %arg1: i32) -> (i32, i32) {
    %c0_i32 = arith.constant 0 : i32
    %c0_i32_0 = arith.constant 0 : i32
    %c0_i32_1 = arith.constant 0 : i32
    return %c0_i32, %c0_i32_0 : i32, i32
  }
  func.func @transform_6(%arg0: i32, %arg1: i32) -> (i32, i32) {
    %c0_i32 = arith.constant 0 : i32
    %c0_i32_0 = arith.constant 0 : i32
    %c0_i32_1 = arith.constant 0 : i32
    return %c0_i32, %c0_i32_0 : i32, i32
  }
  func.func @transform_7(%arg0: i32, %arg1: i32) -> (i32, i32) {
    %c0_i32 = arith.constant 0 : i32
    %c0_i32_0 = arith.constant 0 : i32
    %c0_i32_1 = arith.constant 0 : i32
    return %c0_i32, %c0_i32_0 : i32, i32
  }
  func.func @transform_8(%arg0: i32, %arg1: i32) -> (i32, i32, i32) {
    %c0_i32 = arith.constant 0 : i32
    %c0_i32_0 = arith.constant 0 : i32
    %c0_i32_1 = arith.constant 0 : i32
    return %arg0, %c0_i32, %c0_i32_0 : i32, i32, i32
  }
}

</mosaic_0001>

<bundles_post_ra>
// kernel: tpu_custom_call.1
= control target key start
LH: loop header
LB: loop body
LE: loop exit
PB: predicated region body
PF: predicated region fallthrough
CT: control target
= control target key end

     0   :  { %s1622_s0 = inlined_call_operand.hbm [shape: bf16[2,8,32], index: 0, kind: input, shape index: {}]   ;;  %s1623_s1 = inlined_call_operand.hbm [shape: bf16[2,8,8], index: 1, kind: input, shape index: {}]   ;;  %s1624_s2 = inlined_call_operand.hbm [shape: bf16[1,32,96], index: 2, kind: input, shape index: {}]   ;;  %s1625_s3 = inlined_call_operand.vmem [shape: f32[1,1,96], index: 3, kind: input, shape index: {}]   ;;  %s1626_s4 = inlined_call_operand.hbm [shape: bf16[1,32,32], index: 4, kind: input, shape index: {}]   ;;  %s1627_s5 = inlined_call_operand.vmem [shape: f32[1,32], index: 5, kind: input, shape index: {}]   ;;  %s1628_s6 = inlined_call_operand.vmem [shape: f32[1,32], index: 6, kind: input, shape index: {}]   ;;  %s1629_s7 = inlined_call_operand.vmem [shape: f32[1,32], index: 7, kind: input, shape index: {}]   ;;  %s1630_s8 = inlined_call_operand.hbm [shape: f32[2,8,32], index: 8, kind: output, shape index: {}]  }
   0x1   :  { %1636 = sst [smem:[#allocation23_spill]] %s1624_s2 }
   0x2   :  { %1637 = sst [smem:[#allocation24_spill]] %s1626_s4 }
   0x3   :  { %1638 = sst [smem:[#allocation25_spill]] %s1629_s7 }
   0x4   :  { %13 = vsyncpa [#allocation4], 0 }
   0x5   :  { %15 = vsyncpa [#allocation4 + $0x1], 0 }
   0x6   :  { %16 = vsyncpa [#allocation7], 0 }
   0x7   :  { %18 = vsyncpa [#allocation7 + $0x1], 0 }
   0x8   :  { %19 = vsyncpa [#allocation10], 0 }
   0x9   :  { %20 = vsyncpa [#allocation5], 0 }
   0xa   :  { %22 = vsyncpa [#allocation5 + $0x1], 0  ;;  %s1401_s27 = smov 0   ;;  %s1403_s28 = smov 0  }
   0xb   :  { %s1405_s29 = smov 0   ;;  %s1407_s30 = smov 0  }
   0xc   :  { %s1409_s9 = smov 0   ;;  %s1411_s10 = smov 0  }
   0xd LB: > { %1639 = sst [smem:[#allocation17_spill]] %s1314_s27  ;;  %s1432_s11 = sadd.s32 4294967295, %s1334_s10   ;;  %s1334_s10 = sphi %s1411_s10, %s28_s10   ;;  %s1330_s9 = sphi %s1409_s9, %s1661_s9   ;;  %s1326_s30 = sphi %s1407_s30, %s1657_s30   ;;  %s1322_s29 = sphi %s1405_s29, %s1656_s29   ;;  %s1318_s28 = sphi %s1403_s28, %s1660_s28   ;;  %s1314_s27 = sphi %s1401_s27, %s1659_s27  }
   0xe   : > { %1640 = sst [smem:[#allocation18_spill]] %s1322_s29  ;;  %p942_p0 = scmp.ge.s32.totalorder %s1334_s10, 1 }
   0xf   : > { %1641 = sst [smem:[#allocation19_spill]] %s1330_s9  ;;  %p61_p1 = scmp.eq.s32.totalorder %s1432_s11, 0 }
  0x10   : > { %p249_p2 = scmp.lt.s32.totalorder %s1334_s10, 3  ;;  %s1642_s2 = sld [smem:[#allocation23_spill]] }
  0x11   : > { %s1336_s16 = smov [#allocation8]   ;;  %p945_p6 = scmp.ge.s32.totalorder %s1334_s10, 2 }
  0x12   : > { %p1440_p3 = pnand %p942_p0, %p249_p2  ;;  %s262_s17 = sshll.u32 %s1336_s16, 4  ;;  %s263_s17 = int_to_ptr.vmem [resolvable:$true] %s262_s17 }
  0x13   : > { %s1644_s4 = sld [smem:[#allocation24_spill]]  ;;  %s1337_s21 = smov 64  }
  0x14   : > { %p1004_p4 = pneg %p1440_p3  ;;  %s1338_s22 = smov 4  }
  0x15   : > { %s1339_s23 = smov [#allocation9]   ;;  %s941_s25 = sadd.s32 4294967294, %s1334_s10  }
  0x16   : > { %s260_s14 = sshll.u32 %s1642_s2, 4  ;;  %p1005_p5 = pnand %p1004_p4, %p61_p1  ;;  %s261_s14 = int_to_ptr.hbm [resolvable:$true] %s260_s14 }
  0x17   : > { %s279_s24 = sshll.u32 %s1339_s23, 4  ;;  %s40_s26 = sadd.s32 1, %s1330_s9  ;;  %s280_s24 = int_to_ptr.vmem [resolvable:$true] %s279_s24 }
  0x18   : > { %1007 = dma.hbm_to_vmem [thread:$0]  (!%p1005_p5), %s261_s14, 256, %s263_s17, [#allocation7], %s1337_s21, %s1337_s21, %s1338_s22  }
  0x19   : > { %s277_s20 = sshll.u32 %s1644_s4, 4  ;;  %p42_p7 = scmp.ge.s32.totalorder %s40_s26, 2  ;;  %s278_s20 = int_to_ptr.hbm [resolvable:$true] %s277_s20 }
  0x1a   : > { %1010 = dma.hbm_to_vmem [thread:$0]  (!%p1005_p5), %s278_s20, 256, %s280_s24, [#allocation10], %s1337_s21, %s1337_s21, %s1338_s22  }
  0x1b   : > { %s47_s12 = sadd.s32 1, %s1322_s29  ;;  %p54_p8 = scmp.ne.s32.totalorder %s1322_s29, %s1318_s28 }
  0x1c   : > { %p55_p9 = scmp.eq.s32.totalorder %s1334_s10, 0  ;;  %s1663_s26 = smov (%p42_p7, %s40_s26), 0 }
  0x1d   : > { %1645 = sst [smem:[#allocation20_spill]] %s1663_s26  ;;  %p60_p11 = scmp.ne.s32.totalorder %s1318_s28, %s1314_s27 }
  0x1e   : > { %p1460_p10 = por %p55_p9, %p54_p8  ;;  %s44_s14 = ssub.s32 %s1330_s9, %s1663_s26 }
  0x1f   : > { %p236_p12 = scmp.eq.s32.totalorder %s1432_s11, 1  ;;  %p45_p13 = scmp.eq.s32.totalorder %s44_s14, 0 }
  0x20   : > { %p1471_p0 = por %p61_p1, %p60_p11  ;;  %p242_p4 = scmp.eq.s32.totalorder %s941_s25, 1 }
  0x21   : > { %p1475_p2 = por %p236_p12, %p54_p8  ;;  %p1024_p7 = scmp.lt.s32.totalorder %s1334_s10, 2 }
  0x22   : > { %s1480_s18 = scalar_select %p45_p13, %s1322_s29, %s47_s12  }
  0x23   : > { %p1482_p5 = por %p242_p4, %p60_p11  ;;  %s302_s20 = sand.u32 1, %s1322_s29  }
  0x24   : > { %1649 = sst [smem:[#allocation21_spill]] %s1480_s18  ;;  %s947_s21 = sshll.u32 %s1330_s9, 2 }
  0x25   : > { %s1650_s19 = scalar_select %p1482_p5, 1, 0 }
  0x26   : > { %s946_s22 = sshll.u32 %s302_s20, 2  ;;  %s310_s14 = scalar_lea.hbm %s1622_s0, %s947_s21 }
  0x27   : > { %1651 = sst [smem:[#allocation22_spill]] %s1650_s19  ;;  %s312_s2 = sshll.u32 %s310_s14, 4  ;;  %s313_s2 = int_to_ptr.hbm [resolvable:$true] %s312_s2 }
  0x28   : > { %s306_s4 = scalar_lea.vmem [#allocation3], %s946_s22  ;;  %p1012_p8 = pnand %p1024_p7, %p1460_p10 }
  0x29   : > { %s314_s26 = sshll.u32 %s306_s4, 4  ;;  %s329_s18 = scalar_lea.hbm %s1623_s1, %s947_s21  ;;  %s315_s26 = int_to_ptr.vmem [resolvable:$true] %s314_s26 }
  0x2a   : > { %s321_s19 = sand.u32 1, %s1334_s10   ;;  %s303_s27 = scalar_lea.sflag [#allocation4], %s302_s20 }
  0x2b   : > { %1014 = dma.hbm_to_vmem [thread:$0]  (!%p1012_p8), %s313_s2, 64, %s315_s26, %s303_s27  }
  0x2c   : > { %s331_s9 = sshll.u32 %s329_s18, 4  ;;  %s325_s29 = scalar_lea.vmem [#allocation6], %s946_s22  ;;  %s332_s9 = int_to_ptr.hbm [resolvable:$true] %s331_s9 }
  0x2d   : > { %s333_s7 = sshll.u32 %s325_s29, 4  ;;  %s322_s23 = scalar_lea.sflag [#allocation7], %s321_s19  ;;  %s334_s7 = int_to_ptr.vmem [resolvable:$true] %s333_s7 }
  0x2e   : > { %1017 = dma.hbm_to_vmem [thread:$0]  (!%p1012_p8), %s332_s9, 64, %s334_s7, %s322_s23  }
  0x2f   : > { %342 = sbr.rel (%p1440_p3) target bundleno = 1412 (0x584), region = 52  ;;  %s1501_s4 = sand.u32 (!%p1440_p3), 1, %s1318_s28  }
  0x30   : > { %s951_s13 = sshll.u32 (!%p1440_p3), %s1501_s4, 2  ;;  %s345_s21 = scalar_lea.sflag (!%p1440_p3), [#allocation4], %s1501_s4 }
  0x31   : > { %s348_s20 = scalar_lea.vmem (!%p1440_p3), [#allocation3], %s951_s13 }
  0x34   : > { %1293 = dma.done.wait (%p1471_p0), %s345_s21, 64  }
  0x35   : > { %1295 = vsyncadd (%p1471_p0), %s345_s21, 4294967232  ;;  %s354_s2 = sand.u32 1, %s1432_s11   ;;  %s1510_s27 = scalar_lea.vmem [#allocation6], %s951_s13 }
  0x36   : > { %s355_s7 = scalar_lea.sflag [#allocation7], %s354_s2 }
  0x37   : > { %1297 = dma.done.wait (%p1471_p0), %s355_s7, 64  }
  0x38   : > { %1299 = vsyncadd (%p1471_p0), %s355_s7, 4294967232 }
  0x39   : > { %1301 = dma.done.wait (%p61_p1), [#allocation7], 256  }
  0x3a   : > { %1303 = vsyncadd (%p61_p1), [#allocation7], 4294967040 }
  0x3b   : > { %1305 = dma.done.wait (%p61_p1), [#allocation10], 256  }
  0x3c   : > { %1307 = vsyncadd (%p61_p1), [#allocation10], 4294967040  ;;  %v987_v0 = vld [vmem:[#allocation8 + $0x8] sm:$0xff]  ;;  %v986_v1 = vld [vmem:[#allocation8] sm:$0xff]  ;;  %vm412_vm0 = vcmask 261120   ;;  %s1340_s11 = smov 96  }
  0x3d   : > { %449 = vmatpush.bf16.msra.mxu0 %v987_v0  ;;  %v1524_v2 = vld [vmem:[%s348_s20] sm:$0xf]  ;;  %v1096_v3 = vld [vmem:[%s1625_s3] ss:$0 sm:$0xff]  ;;  %s1341_s15 = smov 104   ;;  %s1342_s26 = smov 120  }
  0x3e   : > { %s1343_s16 = smov 88   ;;  %s1344_s18 = smov 80   ;;  %vm466_vm1 = vcmask 64512   ;;  %v456_v21 = vld [vmem:[%s1510_s27] sm:$0xf]  ;;  %vm504_vm2 = vcmask 1043456  }
  0x3f   : > { %s1345_s19 = smov 72   ;;  %s1346_s22 = smov 112   ;;  %v457_v22 = vunpack.c.l.bf16 %v456_v21  ;;  %vm706_vm3 = vcmask 130048   ;;  %vm708_vm4 = vcmask 195584  }
  0x40   : > { %s1347_s24 = smov 64   ;;  %s1348_s14 = smov 40  }
  0x41   : > { %450 = vmatpush.bf16.msra.mxu0 %v986_v1  ;;  %v458_v23 = vsub.f32 2.0, %v457_v22  ;;  %s1349_s25 = smov 56   ;;  %s1350_s12 = smov 48  }
  0x42   : > { %s1351_s23 = smov 8   ;;  %s1352_s13 = smov 16  }
  0x43   : > { %v459_v24 = vmul.f32 1000000.0, %v458_v23  ;;  %s1353_s21 = smov 24   ;;  %s955_s7 = sshll.u32 %s1501_s4, 3 }
  0x44   : > { %964 = vmatmul.msk.bf16.vlgmr.msra.gmra.mxu0 %vm412_vm0, %v1524_v2  ;;  %s983_s27 = sshll.u32 %s1326_s30, 3  ;;  %s406_s30 = scalar_lea.vmem [#allocation11], %s955_s7 }
  0xc1   : > { %v452_v4 = vpop.f32.mrf.mxu0 }
  0xc2   : > { %v453_v5 = vadd.f32 %v1096_v3, %v452_v4 }
  0xc4   : > { %v460_v6 = vmul.f32 0.35355338, %v453_v5  ;;  %v1531_v7 = vpack.c.bf16 %v453_v5, %v453_v5 }
  0xc6   : > { %v461_v8 = vpack.c.bf16 %v460_v6, %v460_v6  ;;  %464 = vrot.lane.b32.xlu0 %v1531_v7, %s1340_s11 }
  0xc8   : > { %636 = vrot.lane.b32.xlu2 %v461_v8, %s1341_s15  ;;  %522 = vrot.lane.b32.xlu1 %v461_v8, %s1342_s26  ;;  %s810_s26 = scalar_lea.hbm %s1630_s8, %s983_s27 }
  0xc9   : > { %v454_v9 = vpop.f32.mrf.mxu0 }
  0xce   : > { %524 = vrot.lane.b32.xlu0 %v1531_v7, %s1343_s16 }
  0xd0   : > { %581 = vrot.lane.b32.xlu2 %v1531_v7, %s1344_s18  ;;  %638 = vrot.lane.b32.xlu1 %v1531_v7, %s1345_s19  ;;  %s1652_s19 = sld [smem:[#allocation25_spill]] }
  0xd6   : > { %579 = vrot.lane.b32.xlu0 %v461_v8, %s1346_s22  ;;  %s812_s22 = sshll.u32 %s406_s30, 4  ;;  %s813_s22 = int_to_ptr.vmem [resolvable:$true] %s812_s22 }
 0x122   : > { %v637_v10 = vpop.permute.xlu2 %636 }
 0x12a   : > { %v582_v11 = vpop.permute.xlu2 %581 }
 0x12b   : > { %v587_v12 = vsel %vm466_vm1, %v582_v11, 0 }
 0x12c   : > { %596 = vmatpush.bf16.xpose.msrb.mxu0 %v587_v12 }
 0x138   : > { %v465_v13 = vpop.permute.xlu0 %464 }
 0x139   : > { %v471_v14 = vsel %vm466_vm1, %v465_v13, 0 }
 0x13a   : > { %480 = vmatpush.bf16.xpose.msra.mxu1 %v471_v14  ;;  %v523_v15 = vpop.permute.xlu1 %522 }
 0x140   : > { %v525_v16 = vpop.permute.xlu0 %524 }
 0x141   : > { %965 = vmatmul.msk.bf16.vlgmr.msra.gmra.mxu1 %vm466_vm1, %v461_v8  ;;  %v530_v17 = vsel %vm466_vm1, %v525_v16, 0 }
 0x142   : > { %539 = vmatpush.bf16.xpose.msra.mxu3 %v530_v17  ;;  %v639_v18 = vpop.permute.xlu1 %638 }
 0x143   : > { %v644_v19 = vsel %vm466_vm1, %v639_v18, 0 }
 0x148   : > { %v580_v20 = vpop.permute.xlu0 %579 }
 0x149   : > { %967 = vmatmul.msk.bf16.vlgmr.msra.gmra.mxu3 %vm466_vm1, %v523_v15  ;;  %969 = vmatmul.msk.bf16.vlgmr.msrb.gmra.mxu0 %vm466_vm1, %v580_v20 }
 0x14a   : > { %653 = vmatpush.bf16.xpose.msrb.mxu3 %v644_v19 }
 0x159   : > { %971 = vmatmul.msk.bf16.vlgmr.msrb.gmra.mxu3 %vm466_vm1, %v637_v10 }
 0x1be   : > { %v482_v25 = vpop.f32.mrf.mxu1 }
 0x1bf   : > { %v486_v26 = vsub.f32 %v482_v25, %v459_v24 }
 0x1c1   : > { %v487_v27 = vsel %vm466_vm1, %v486_v26, -inf }
 0x1c2   : > { %488 = vmax.xlane.f32.xlu1 %v487_v27 }
 0x1c6   : > { %v484_v28 = vpop.f32.mrf.mxu1  ;;  %v598_v29 = vpop.f32.mrf.mxu0 }
 0x1c7   : > { %v602_v34 = vsub.f32 %v598_v29, %v459_v24 }
 0x1c9   : > { %v603_v36 = vsel %vm466_vm1, %v602_v34, -inf }
 0x1cc   : > { %v541_v30 = vpop.f32.mrf.mxu3 }
 0x1cd   : > { %v545_v31 = vsub.f32 %v541_v30, %v459_v24  ;;  %v989_v30 = vld [vmem:[#allocation9 + $0x8] sm:$0xff] }
 0x1ce   : > { %v600_v32 = vpop.f32.mrf.mxu0  ;;  %739 = vmatpush.bf16.msra.mxu0 %v989_v30 }
 0x1cf   : > { %v546_v33 = vsel %vm466_vm1, %v545_v31, -inf  ;;  %v1354_v32 = vmov 0.0  }
 0x1d0   : > { %547 = vmax.xlane.f32.xlu2 %v546_v33  ;;  %413 = vst.msk [vmem:[#allocation2] sm:$0xff] %vm412_vm0, %v1354_v32 }
 0x1d4   : > { %v543_v35 = vpop.f32.mrf.mxu3 }
 0x1d8   : > { %604 = vmax.xlane.f32.xlu2 %v603_v36 }
 0x1dc   : > { %v655_v37 = vpop.f32.mrf.mxu3 }
 0x1dd   : > { %v659_v38 = vsub.f32 %v655_v37, %v459_v24 }
 0x1df   : > { %v660_v39 = vsel %vm466_vm1, %v659_v38, -inf }
 0x1e0   : > { %661 = vmax.xlane.f32.xlu0 %v660_v39 }
 0x1e4   : > { %v657_v40 = vpop.f32.mrf.mxu3 }
 0x1e5   : > { %v710_v40 = vld [vmem:[#allocation2] sm:$0xff] }
 0x1f0   : > { %499 = vrot.lane.b32.xlu2 %v1531_v7, %s1347_s24  ;;  %s814_s24 = sshll.u32 %s810_s26, 4  ;;  %s815_s24 = int_to_ptr.hbm [resolvable:$true] %s814_s24 }
 0x1f8   : > { %672 = vrot.lane.b32.xlu2 %v1531_v7, %s1348_s14  ;;  %s800_s14 = scalar_lea.sflag [#allocation5], %s1501_s4 }
 0x235   : > { %v489_v41 = vpop.xlane.xlu1 %488 }
 0x236   : > { %v490_v42 = vsub.f32 %v486_v26, %v489_v41 }
 0x238   : > { %v491_v43 = vmul.f32 1.442695, %v490_v42 }
 0x23a   : > { %1100 = vpow2.f32 %v491_v43  ;;  %v1097_v43 = vld [vmem:[%s1627_s5] ss:$0 sm:$0xff] }
 0x240   : > { %v1101_v44 = vpop.eup %1100 }
 0x241   : > { %v493_v45 = vsel %vm466_vm1, %v1101_v44, 0.0 }
 0x242   : > { %494 = vadd.xlane.f32.xlu1 %v493_v45  ;;  %v757_v45 = vunpack.c.l.bf16 %v1524_v2 }
 0x243   : > { %v548_v46 = vpop.xlane.xlu2 %547 }
 0x244   : > { %v549_v49 = vsub.f32 %v545_v31, %v548_v46  ;;  %v988_v31 = vld [vmem:[#allocation9] sm:$0xff] }
 0x245   : > { %740 = vmatpush.bf16.msra.mxu0 %v988_v31 }
 0x246   : > { %v550_v51 = vmul.f32 1.442695, %v549_v49 }
 0x24b   : > { %v605_v47 = vpop.xlane.xlu2 %604 }
 0x24c   : > { %v606_v48 = vsub.f32 %v602_v34, %v605_v47 }
 0x24e   : > { %v607_v50 = vmul.f32 1.442695, %v606_v48 }
 0x250   : > { %1102 = vpow2.f32 %v607_v50  ;;  %v1355_v50 = vmov 32.0  }
 0x251   : > { %1104 = vpow2.f32 %v550_v51 }
 0x253   : > { %v500_v52 = vpop.permute.xlu2 %499  ;;  %v662_v53 = vpop.xlane.xlu0 %661 }
 0x254   : > { %v506_v54 = vsel %vm504_vm2, %v500_v52, 0  ;;  %v663_v56 = vsub.f32 %v659_v38, %v662_v53 }
 0x255   : > { %515 = vmatpush.bf16.msra.mxu2 %v506_v54 }
 0x256   : > { %v1103_v55 = vpop.eup %1102  ;;  %v664_v58 = vmul.f32 1.442695, %v663_v56 }
 0x257   : > { %v609_v57 = vsel %vm466_vm1, %v1103_v55, 0.0  ;;  %v1105_v59 = vpop.eup %1104 }
 0x258   : > { %610 = vadd.xlane.f32.xlu0 %v609_v57  ;;  %1106 = vpow2.f32 %v664_v58  ;;  %v552_v60 = vsel %vm466_vm1, %v1105_v59, 0.0 }
 0x25b   : > { %558 = vrot.lane.b32.xlu1 %v1531_v7, %s1349_s25  ;;  %v673_v5 = vpop.permute.xlu2 %672  ;;  %s1254_s25 = sshra.s32 %s815_s24, 4  ;;  %s1255_s25 = int_to_ptr.hbm [resolvable:$true] %s1254_s25 }
 0x25c   : > { %v678_v9 = vsel %vm504_vm2, %v673_v5, 0  ;;  %p1261_p10 = scmp.lt.s32.totalorder %s1255_s25, %s1630_s8 }
 0x25e   : > { %v1107_v61 = vpop.eup %1106 }
 0x25f   : > { %v666_v62 = vsel %vm466_vm1, %v1107_v61, 0.0 }
 0x260   : > { %553 = vadd.xlane.f32.xlu0 %v552_v60 }
 0x268   : > { %667 = vadd.xlane.f32.xlu0 %v666_v62 }
 0x27c   : > { %615 = vrot.lane.b32.xlu0 %v1531_v7, %s1350_s12  ;;  %s1256_s12 = scalar_lea.hbm %s1255_s25, 8 }
 0x27d   : > { %p1257_p1 = scmp.ne.s32.totalorder %s1255_s25, %s1256_s12 }
 0x27f   : > { %p1258_p3 = pnand %p1257_p1, %p1475_p2 }
 0x281   : > { %p1259_p9 = pneg %p1258_p3 }
 0x2b5   : > { %v495_v63 = vpop.xlane.xlu1 %494 }
 0x2b6   : > { %1108 = vrcp.f32 %v495_v63 }
 0x2bc   : > { %v1109_v0 = vpop.eup %1108 }
 0x2bd   : > { %v497_v1 = vmul.f32 %v1109_v0, %v1101_v44 }
 0x2bf   : > { %v498_v3 = vpack.c.bf16 %v497_v1, %v497_v1 }
 0x2c1   : > { %966 = vmatmul.msk.bf16.vlgmr.msra.gmra.mxu2 %vm466_vm1, %v498_v3 }
 0x2cb   : > { %v611_v4 = vpop.xlane.xlu0 %610 }
 0x2cd   : > { %v559_v6 = vpop.permute.xlu1 %558 }
 0x2ce   : > { %v564_v8 = vsel %vm504_vm2, %v559_v6, 0 }
 0x2cf   : > { %573 = vmatpush.bf16.msrb.mxu2 %v564_v8  ;;  %v1098_v8 = vld [vmem:[%s1628_s6] ss:$0 sm:$0xff] }
 0x2d3   : > { %687 = vmatpush.bf16.msra.mxu2 %v678_v9  ;;  %v554_v10 = vpop.xlane.xlu0 %553 }
 0x2d4   : > { %1110 = vrcp.f32 %v554_v10 }
 0x2da   : > { %v1111_v11 = vpop.eup %1110 }
 0x2db   : > { %v556_v7 = vmul.f32 %v1111_v11, %v1105_v59  ;;  %v668_v12 = vpop.xlane.xlu0 %667  ;;  %v1099_v11 = vld [vmem:[%s1652_s19] ss:$0 sm:$0xff] }
 0x2dc   : > { %1112 = vrcp.f32 %v668_v12 }
 0x2dd   : > { %v557_v13 = vpack.c.bf16 %v556_v7, %v556_v7  ;;  %1114 = vrcp.f32 %v611_v4 }
 0x2de   : > { %1116 = vrcp.f32 %v1355_v50 }
 0x2df   : > { %968 = vmatmul.msk.bf16.vlgmr.msrb.gmra.mxu2 %vm466_vm1, %v557_v13 }
 0x2e2   : > { %v1113_v14 = vpop.eup %1112 }
 0x2e3   : > { %v670_v15 = vmul.f32 %v1113_v14, %v1107_v61  ;;  %v1115_v16 = vpop.eup %1114 }
 0x2e4   : > { %v613_v17 = vmul.f32 %v1115_v16, %v1103_v55  ;;  %v1117_v51 = vpop.eup %1116 }
 0x2e5   : > { %v671_v18 = vpack.c.bf16 %v670_v15, %v670_v15  ;;  %v763_v52 = vmul.f32 32.0, %v1117_v51  ;;  %vm767_vm5 = vweird.f32 %v1117_v51 }
 0x2e6   : > { %v614_v21 = vpack.c.bf16 %v613_v17, %v613_v17 }
 0x2e7   : > { %v764_v53 = vsub.f32 1.0, %v763_v52 }
 0x2e9   : > { %v765_v54 = vmul.f32 %v1117_v51, %v764_v53 }
 0x2eb   : > { %v766_v55 = vadd.f32 %v1117_v51, %v765_v54 }
 0x2ed   : > { %v768_v56 = vsel %vm767_vm5, %v1117_v51, %v766_v55 }
 0x2ee   : > { %v616_v19 = vpop.permute.xlu0 %615 }
 0x2ef   : > { %972 = vmatmul.msk.bf16.vlgmr.msra.gmra.mxu2 %vm466_vm1, %v671_v18  ;;  %v621_v20 = vsel %vm504_vm2, %v616_v19, 0 }
 0x2f0   : > { %630 = vmatpush.bf16.msrb.mxu1 %v621_v20 }
 0x2f3   : > { %970 = vmatmul.msk.bf16.vlgmr.msrb.gmra.mxu1 %vm466_vm1, %v614_v21 }
 0x344   : > { %v517_v22 = vpop.f32.mrf.mxu2 }
 0x34c   : > { %v519_v23 = vpop.f32.mrf.mxu2 }
 0x362   : > { %v575_v24 = vpop.f32.mrf.mxu2 }
 0x363   : > { %694 = vrot.lane.b32.xlu1 %v575_v24, %s1351_s23 }
 0x36a   : > { %v577_v25 = vpop.f32.mrf.mxu2 }
 0x370   : > { %v632_v26 = vpop.f32.mrf.mxu1 }
 0x371   : > { %698 = vrot.lane.b32.xlu2 %v632_v26, %s1352_s13 }
 0x372   : > { %v689_v27 = vpop.f32.mrf.mxu2 }
 0x373   : > { %702 = vrot.lane.b32.xlu1 %v689_v27, %s1353_s21  ;;  %s1260_s21 = scalar_lea.hbm %s1630_s8, 16 }
 0x374   : > { %p1262_p11 = scmp.lt.s32.totalorder %s1260_s21, %s1256_s12 }
 0x376   : > { %p1263_p12 = por %p1262_p11, %p1261_p10 }
 0x378   : > { %v634_v28 = vpop.f32.mrf.mxu1  ;;  %p1264_p13 = pnand %p1263_p12, %p1259_p9 }
 0x37a   : > { %v691_v29 = vpop.f32.mrf.mxu2 }
 0x3cb   : > { %v699_v35 = vpop.permute.xlu2 %698 }
 0x3d5   : > { %v695_v33 = vpop.permute.xlu1 %694 }
 0x3d6   : > { %v705_v34 = vsel %vm466_vm1, %v517_v22, %v695_v33 }
 0x3d7   : > { %v707_v37 = vsel %vm706_vm3, %v705_v34, %v699_v35 }
 0x3e5   : > { %v703_v36 = vpop.permute.xlu1 %702 }
 0x3e6   : > { %v709_v38 = vsel %vm708_vm4, %v707_v37, %v703_v36 }
 0x3e7   : > { %v711_v39 = vpack.c.bf16 %v709_v38, %v709_v38 }
 0x3e9   : > { %981 = vmatmul.msk.bf16.vlgmr.msra.gmra.mxu0 %vm412_vm0, %v711_v39 }
 0x466   : > { %v742_v41 = vpop.f32.mrf.mxu0 }
 0x467   : > { %v746_v42 = vadd.f32 %v742_v41, %v710_v40 }
 0x469   : > { %747 = vst.msk [vmem:[#allocation2] sm:$0xff] %vm412_vm0, %v746_v42 }
 0x46e   : > { %v744_v44 = vpop.f32.mrf.mxu0 }
 0x470   : > { %v751_v46 = vld [vmem:[#allocation2] sm:$0xff] }
 0x471   : > { %v756_v47 = vadd.f32 %v1097_v43, %v751_v46 }
 0x473   : > { %v758_v48 = vadd.f32 %v757_v45, %v756_v47 }
 0x475   : > { %v759_v49 = vsel %vm412_vm0, %v758_v48, 0.0 }
 0x476   : > { %760 = vadd.xlane.f32.xlu2 %v759_v49 }
 0x4e9   : > { %v761_v57 = vpop.xlane.xlu2 %760 }
 0x4ea   : > { %v769_v58 = vmul.f32 %v768_v56, %v761_v57 }
 0x4ec   : > { %v770_v2 = vsub.f32 %v758_v48, %v769_v58 }
 0x4ee   : > { %v771_v59 = vmul.f32 %v770_v2, %v770_v2 }
 0x4f0   : > { %v772_v60 = vsel %vm412_vm0, %v771_v59, 0.0 }
 0x4f1   : > { %773 = vadd.xlane.f32.xlu1 %v772_v60 }
 0x564   : > { %v774_v61 = vpop.xlane.xlu1 %773 }
 0x565   : > { %v775_v62 = vmul.f32 %v774_v61, %v768_v56 }
 0x567   : > { %v776_v63 = vadd.f32 1e-12, %v775_v62 }
 0x569   : > { %1118 = vrsqrt.f32 %v776_v63  ;;  %vm783_vm7 = vweird.f32 %v776_v63 }
 0x56f   : > { %v1119_v0 = vpop.eup %1118 }
 0x570   : > { %v778_v1 = vmul.f32 %v1119_v0, %v776_v63  ;;  %vm784_vm6 = vweird.f32 %v1119_v0 }
 0x571   : > { %vm785_vm8 = vmor %vm783_vm7, %vm784_vm6 }
 0x572   : > { %v779_v3 = vmul.f32 %v1119_v0, %v778_v1 }
 0x574   : > { %v780_v4 = vmul.f32 0.5, %v779_v3 }
 0x576   : > { %v781_v5 = vsub.f32 1.5, %v780_v4 }
 0x578   : > { %v782_v6 = vmul.f32 %v1119_v0, %v781_v5 }
 0x57a   : > { %v786_v9 = vsel %vm785_vm8, %v1119_v0, %v782_v6 }
 0x57b   : > { %v787_v10 = vmul.f32 %v786_v9, %v770_v2 }
 0x57d   : > { %v792_v7 = vmul.f32 %v1098_v8, %v787_v10 }
 0x57f   : > { %v797_v12 = vadd.f32 %v1099_v11, %v792_v7 }
 0x581   : > { %798 = vst.msk [vmem:[%s406_s30] sm:$0xff] %vm412_vm0, %v797_v12 }
 0x582   : > { %1267 = shalt.err (!%p1264_p13)
}
 0x583   : > { %1002 = dma.vmem_to_hbm [thread:$0]  (%p1475_p2), %s813_s22, 128, %s815_s24, %s800_s14  }
 0x584 PF: > { %s1653_s4 = sld [smem:[#allocation17_spill]]  ;;  %p1019_p0 = pnand %p945_p6, %p1482_p5 }
 0x586   : > { %p1020_p4 = pneg %p1019_p0 }
 0x58a   : > { %s826_s27 = sand.u32 1, %s1653_s4  }
 0x58b   : > { %s827_s29 = scalar_lea.sflag [#allocation5], %s826_s27 }
 0x58c   : > { %1309 = dma.done.wait (%p1020_p4), %s827_s29, 128  }
 0x58d   : > { %1311 = vsyncadd (%p1020_p4), %s827_s29, 4294967168  ;;  %s28_s10 = sadd.s32 1, %s1334_s10   ;;  %s1655_s9 = sld [smem:[#allocation18_spill]] }
 0x58e   : > { %p25_p7 = scmp.ge.s32.totalorder %s28_s10, 4   ;;  %s1656_s29 = sld [smem:[#allocation21_spill]] }
 0x58f   : > { %s1657_s30 = sld [smem:[#allocation19_spill]]  ;;  %s1659_s27 = smov %s1318_s28 }
 0x590   : > { %s1658_s17 = sld [smem:[#allocation20_spill]] }
 0x592   :  { %27 = sbr.rel (!%p25_p7) target bundleno = 13 (0xd), region = 129 }
 0x593   : > { %s1660_s28 = smov %s1655_s9 }
 0x596   : > { %s1661_s9 = smov %s1658_s17 }
 0x597   :  { %833 = vsyncpa [#allocation4], 1 }
 0x598   :  { %835 = vsyncpa [#allocation4 + $0x1], 1 }
 0x599   :  { %836 = vsyncpa [#allocation7], 1 }
 0x59a   :  { %838 = vsyncpa [#allocation7 + $0x1], 1 }
 0x59b   :  { %839 = vsyncpa [#allocation10], 1 }
 0x59c   :  { %840 = vsyncpa [#allocation5], 1 }
 0x59d   :  { %842 = vsyncpa [#allocation5 + $0x1], 1 }

</bundles_post_ra>
